<compile_context>
chip_gen: v7x
topology: tpu7x:2x2x1
jax: 0.10.0
libtpu: 0.0.40
codegen_flags: <defaults>
</compile_context>

<pallas_src>
import math

import jax
import jax.numpy as jnp
from jax.experimental import pallas as pl
from jax.experimental.pallas import tpu as pltpu


# -------------------- in-kernel exact (erf) GELU --------------------
# PyTorch's default GELU is the exact erf form. erf uses the Abramowitz & Stegun
# 7.1.26 polynomial (|err| <= 1.5e-7); the divide uses the EUP approximate
# reciprocal so the polynomial does not saturate the VALU slot.

_SQRT_HALF = 0.7071067811865476


def _erf_approx(z):
    a1, a2, a3, a4, a5 = 0.254829592, -0.284496736, 1.421413741, -1.453152027, 1.061405429
    p = 0.3275911
    sign = jnp.where(z >= 0.0, 1.0, -1.0)
    az = jnp.abs(z)
    t = pl.reciprocal(1.0 + p * az, approx=True)          # EUP slot, not VALU divide
    poly = ((((a5 * t + a4) * t + a3) * t + a2) * t + a1) * t
    return sign * (1.0 - poly * jnp.exp(-az * az))


def _gelu_exact(x):
    return 0.5 * x * (1.0 + _erf_approx(x * _SQRT_HALF))


# -------------------- fused MLP kernel --------------------

def _mlp_kernel(x_ref, w1_ref, b1_ref, w2_ref, b2_ref, o_ref):
    # fc1 on the MXU, f32 accumulation.
    h = jnp.dot(x_ref[...], w1_ref[...], preferred_element_type=jnp.float32)
    # bias + exact-erf GELU in f32 (VPU/EUP); hidden activation never leaves VMEM/vregs.
    h = _gelu_exact(h + b1_ref[...])
    # fc2 on the MXU in the MXU input dtype, f32 accumulation.
    y = jnp.dot(h.astype(w2_ref.dtype), w2_ref[...], preferred_element_type=jnp.float32)
    o_ref[...] = (y + b2_ref[...]).astype(o_ref.dtype)


# -------------------- wrapper --------------------

def _pick_tile_m(m):
    """Row-tile choice: keep the MXU fed, only split when each step stays >=256 rows."""
    if m >= 1024:
        return 512          # biggest pipelined tile; still >=2 "parallel" steps
    if m >= 512:
        return 256          # >=2 steps for v7x megacore, each still MXU-full
    return m                # small m: single full-extent block (no per-step overhead)


def _resident_spec(shape):
    """Constant-index operand (weights/biases): VMEM-resident, single-buffered."""
    index_map = lambda i: (0, 0)
    try:
        return pl.BlockSpec(shape, index_map, pipeline_mode=pl.Buffered(1))
    except TypeError:  # older jax without pipeline_mode kwarg: default buffering
        return pl.BlockSpec(shape, index_map)


def mlp_forward(x, params, *, mxu_dtype=jnp.bfloat16, out_dtype=None):
    """x: (..., d_in) -> (..., d_out); fused fc1 -> GELU -> fc2 in one pallas_call.

    mxu_dtype: dtype fed to the MXU (default bf16; accumulation/bias/GELU stay f32).
               Pass None for an f32-parity / debug path (results then differ from
               the default path at ~1e-2 because of bf16 input rounding).
    out_dtype: output dtype (default: dtype of `x`).
    """
    w1, b1, w2, b2 = params["w1"], params["b1"], params["w2"], params["b2"]
    d_in, hidden = w1.shape
    d_out = w2.shape[1]
    lead = x.shape[:-1]
    m = math.prod(lead) if lead else 1
    out_dtype = jnp.dtype(out_dtype or x.dtype)

    if mxu_dtype is not None:
        x = x.astype(mxu_dtype)
        w1 = w1.astype(mxu_dtype)
        w2 = w2.astype(mxu_dtype)

    x2 = x.reshape(m, d_in)
    b1_2 = b1.reshape(1, hidden).astype(jnp.float32)
    b2_2 = b2.reshape(1, d_out).astype(jnp.float32)

    tm = _pick_tile_m(m)
    grid = (pl.cdiv(m, tm),)   # ragged last block handled by Pallas (rows independent)

    in_itemsize = jnp.dtype(x2.dtype).itemsize
    out_itemsize = out_dtype.itemsize

    # Explicit VMEM budget: resident weights (single-buffered) + double-buffered
    # activation/output tiles + the (tm, hidden) f32 hidden intermediate, with headroom.
    weight_bytes = (d_in * hidden + hidden * d_out) * in_itemsize + (hidden + d_out) * 4
    stream_bytes = 2 * tm * d_in * in_itemsize + 2 * tm * d_out * out_itemsize
    hidden_bytes = tm * hidden * 4
    vmem_limit = int(1.25 * (weight_bytes + stream_bytes + hidden_bytes)) + (4 << 20)
    vmem_limit = min(max(vmem_limit, 32 << 20), 100 << 20)
    # TODO(synk): for MLPs whose resident weights + (tm, hidden) temp exceed ~48 MiB
    # (v7x's 64 MiB VMEM), add a second "arbitrary" grid axis over `hidden` with an
    # f32 accumulator scratch (pl.when init/finalize) instead of shrinking tm.

    cost = pl.CostEstimate(
        flops=2 * m * (d_in * hidden + hidden * d_out),
        transcendentals=m * hidden,
        bytes_accessed=int(m * d_in * in_itemsize + weight_bytes + m * d_out * out_itemsize),
    )

    out = pl.pallas_call(
        _mlp_kernel,
        out_shape=jax.ShapeDtypeStruct((m, d_out), out_dtype),
        grid=grid,
        in_specs=[
            pl.BlockSpec((tm, d_in), lambda i: (i, 0)),   # row tile of activations
            _resident_spec((d_in, hidden)),               # fc1 weight (VMEM resident)
            _resident_spec((1, hidden)),                  # fc1 bias
            _resident_spec((hidden, d_out)),              # fc2 weight (VMEM resident)
            _resident_spec((1, d_out)),                   # fc2 bias
        ],
        out_specs=pl.BlockSpec((tm, d_out), lambda i: (i, 0)),
        compiler_params=pltpu.CompilerParams(
            dimension_semantics=("parallel",),
            vmem_limit_bytes=vmem_limit,
        ),
        cost_estimate=cost,
    )(x2, w1, b1_2, w2, b2_2)

    return out.reshape(*lead, d_out)


# -------------------- deterministic parameter init (PyTorch Linear style) --------------------

def init_mlp_params(key, d_in, hidden, d_out):
    k1, k2, k3, k4 = jax.random.split(key, 4)
    lim1 = 1.0 / math.sqrt(d_in)
    lim2 = 1.0 / math.sqrt(hidden)
    return dict(
        w1=jax.random.uniform(k1, (d_in, hidden), jnp.float32, -lim1, lim1),
        b1=jax.random.uniform(k2, (hidden,), jnp.float32, -lim1, lim1),
        w2=jax.random.uniform(k3, (hidden, d_out), jnp.float32, -lim2, lim2),
        b2=jax.random.uniform(k4, (d_out,), jnp.float32, -lim2, lim2),
    )


# -------------------- pure-JAX reference (for verification) --------------------

def mlp_reference(x, params, mxu_dtype=None):
    w1, b1, w2, b2 = params["w1"], params["b1"], params["w2"], params["b2"]
    if mxu_dtype is not None:
        x = x.astype(mxu_dtype)
        w1 = w1.astype(mxu_dtype)
        w2 = w2.astype(mxu_dtype)
    h = jnp.dot(x, w1, preferred_element_type=jnp.float32) + b1.astype(jnp.float32)
    h = jax.nn.gelu(h, approximate=False)            # exact erf GELU (PyTorch default)
    y = jnp.dot(h.astype(w2.dtype), w2, preferred_element_type=jnp.float32)
    return y + b2.astype(jnp.float32)


if __name__ == "__main__":
    B, S = 2, 8                           # batch, sequence
    D_IN, HIDDEN, D_OUT = 128, 256, 128   # lane-dense channel widths (multiples of 128)

    key = jax.random.PRNGKey(0)
    kx, kp = jax.random.split(key)
    x = jax.random.normal(kx, (B, S, D_IN), jnp.float32)
    params = init_mlp_params(kp, D_IN, HIDDEN, D_OUT)

    # Default fast path: bf16 MXU inputs, f32 accumulation, f32 output.
    out = jax.block_until_ready(mlp_forward(x, params))
    ref = jax.block_until_ready(mlp_reference(x, params, mxu_dtype=jnp.bfloat16))
    assert out.shape == (B, S, D_OUT), out.shape
    assert out.dtype == jnp.float32, out.dtype
    assert jnp.allclose(out, ref, rtol=2.5e-2, atol=2.5e-2), float(jnp.max(jnp.abs(out - ref)))

    # f32 parity / debug path (no bf16 input rounding).
    out32 = jax.block_until_ready(mlp_forward(x, params, mxu_dtype=None))
    ref32 = jax.block_until_ready(mlp_reference(x, params, mxu_dtype=None))
    assert jnp.allclose(out32, ref32, rtol=1e-2, atol=1e-2), float(jnp.max(jnp.abs(out32 - ref32)))

    print("KERNEL_OK")
</pallas_src>

<mosaic_0001>
module attributes {stable_mosaic.version = 11 : i64} {
  func.func @_mlp_kernel(%arg0: i32, %arg1: memref<16x128xbf16, #tpu.memory_space<vmem>>, %arg2: memref<128x256xbf16, #tpu.memory_space<vmem>>, %arg3: memref<1x256xf32, #tpu.memory_space<vmem>>, %arg4: memref<256x128xbf16, #tpu.memory_space<vmem>>, %arg5: memref<1x128xf32, #tpu.memory_space<vmem>>, %arg6: memref<16x128xf32, #tpu.memory_space<vmem>>) attributes {dimension_semantics = [#tpu.dimension_semantics<parallel>], iteration_bounds = array<i64: 1>, scalar_prefetch = 0 : i64, scratch_operands = 0 : i64, tpu.core_type = #tpu.core_type<tc>, window_params = [{transform_indices = @transform_0, window_bounds = array<i64: 16, 128>}, {pipeline_mode = #tpu.pipeline_mode<synchronous>, transform_indices = @transform_1, window_bounds = array<i64: 128, 256>}, {pipeline_mode = #tpu.pipeline_mode<synchronous>, transform_indices = @transform_2, window_bounds = array<i64: 1, 256>}, {pipeline_mode = #tpu.pipeline_mode<synchronous>, transform_indices = @transform_3, window_bounds = array<i64: 256, 128>}, {pipeline_mode = #tpu.pipeline_mode<synchronous>, transform_indices = @transform_4, window_bounds = array<i64: 1, 128>}, {transform_indices = @transform_5, window_bounds = array<i64: 16, 128>}]} {
    %c0 = arith.constant 0 : index
    %c0_0 = arith.constant 0 : index
    %0 = vector.load %arg1[%c0, %c0_0] : memref<16x128xbf16, #tpu.memory_space<vmem>>, vector<16x128xbf16>
    %c0_1 = arith.constant 0 : index
    %c0_2 = arith.constant 0 : index
    %1 = vector.load %arg2[%c0_1, %c0_2] : memref<128x256xbf16, #tpu.memory_space<vmem>>, vector<128x256xbf16>
    %cst = arith.constant dense<0.000000e+00> : vector<16x256xf32>
    %2 = tpu.matmul %0, %1, %cst {dimension_numbers = #tpu.dot_dimension_numbers<[1], [0], [0], [1], [0, 0, 1, 1], [], []>} : vector<16x128xbf16>, vector<128x256xbf16>, vector<16x256xf32> -> vector<16x256xf32>
    %c0_3 = arith.constant 0 : index
    %c0_4 = arith.constant 0 : index
    %3 = vector.load %arg3[%c0_3, %c0_4] : memref<1x256xf32, #tpu.memory_space<vmem>>, vector<1x256xf32>
    %4 = vector.broadcast %3 : vector<1x256xf32> to vector<16x256xf32>
    %5 = arith.addf %2, %4 : vector<16x256xf32>
    %cst_5 = arith.constant 5.000000e-01 : f32
    %6 = vector.broadcast %cst_5 : f32 to vector<16x256xf32>
    %7 = arith.mulf %6, %5 : vector<16x256xf32>
    %cst_6 = arith.constant 0.707106769 : f32
    %8 = vector.broadcast %cst_6 : f32 to vector<16x256xf32>
    %9 = arith.mulf %5, %8 : vector<16x256xf32>
    %cst_7 = arith.constant 0.000000e+00 : f32
    %10 = vector.broadcast %cst_7 : f32 to vector<16x256xf32>
    %11 = arith.cmpf oge, %9, %10 : vector<16x256xf32>
    %cst_8 = arith.constant 1.000000e+00 : f32
    %cst_9 = arith.constant -1.000000e+00 : f32
    %12 = vector.broadcast %cst_8 : f32 to vector<16x256xf32>
    %13 = vector.broadcast %cst_9 : f32 to vector<16x256xf32>
    %14 = arith.select %11, %12, %13 : vector<16x256xi1>, vector<16x256xf32>
    %15 = math.absf %9 : vector<16x256xf32>
    %cst_10 = arith.constant 0.327591091 : f32
    %16 = vector.broadcast %cst_10 : f32 to vector<16x256xf32>
    %17 = arith.mulf %16, %15 : vector<16x256xf32>
    %cst_11 = arith.constant 1.000000e+00 : f32
    %18 = vector.broadcast %cst_11 : f32 to vector<16x256xf32>
    %19 = arith.addf %18, %17 : vector<16x256xf32>
    %20 = tpu.reciprocal %19 {approx = true} : vector<16x256xf32> -> vector<16x256xf32>
    %cst_12 = arith.constant 1.06140542 : f32
    %21 = vector.broadcast %cst_12 : f32 to vector<16x256xf32>
    %22 = arith.mulf %21, %20 : vector<16x256xf32>
    %cst_13 = arith.constant -1.45315206 : f32
    %23 = vector.broadcast %cst_13 : f32 to vector<16x256xf32>
    %24 = arith.addf %22, %23 : vector<16x256xf32>
    %25 = arith.mulf %24, %20 : vector<16x256xf32>
    %cst_14 = arith.constant 1.42141378 : f32
    %26 = vector.broadcast %cst_14 : f32 to vector<16x256xf32>
    %27 = arith.addf %25, %26 : vector<16x256xf32>
    %28 = arith.mulf %27, %20 : vector<16x256xf32>
    %cst_15 = arith.constant -0.284496725 : f32
    %29 = vector.broadcast %cst_15 : f32 to vector<16x256xf32>
    %30 = arith.addf %28, %29 : vector<16x256xf32>
    %31 = arith.mulf %30, %20 : vector<16x256xf32>
    %cst_16 = arith.constant 0.254829586 : f32
    %32 = vector.broadcast %cst_16 : f32 to vector<16x256xf32>
    %33 = arith.addf %31, %32 : vector<16x256xf32>
    %34 = arith.mulf %33, %20 : vector<16x256xf32>
    %cst_17 = arith.constant 0.000000e+00 : f32
    %35 = vector.broadcast %cst_17 : f32 to vector<16x256xf32>
    %36 = arith.subf %35, %15 : vector<16x256xf32>
    %37 = arith.mulf %36, %15 : vector<16x256xf32>
    %38 = math.exp %37 : vector<16x256xf32>
    %39 = arith.mulf %34, %38 : vector<16x256xf32>
    %cst_18 = arith.constant 1.000000e+00 : f32
    %40 = vector.broadcast %cst_18 : f32 to vector<16x256xf32>
    %41 = arith.subf %40, %39 : vector<16x256xf32>
    %42 = arith.mulf %14, %41 : vector<16x256xf32>
    %cst_19 = arith.constant 1.000000e+00 : f32
    %43 = vector.broadcast %cst_19 : f32 to vector<16x256xf32>
    %44 = arith.addf %43, %42 : vector<16x256xf32>
    %45 = arith.mulf %7, %44 : vector<16x256xf32>
    %46 = arith.truncf %45 : vector<16x256xf32> to vector<16x256xbf16>
    %c0_20 = arith.constant 0 : index
    %c0_21 = arith.constant 0 : index
    %47 = vector.load %arg4[%c0_20, %c0_21] : memref<256x128xbf16, #tpu.memory_space<vmem>>, vector<256x128xbf16>
    %cst_22 = arith.constant dense<0.000000e+00> : vector<16x128xf32>
    %48 = tpu.matmul %46, %47, %cst_22 {dimension_numbers = #tpu.dot_dimension_numbers<[1], [0], [0], [1], [0, 0, 1, 1], [], []>} : vector<16x256xbf16>, vector<256x128xbf16>, vector<16x128xf32> -> vector<16x128xf32>
    %c0_23 = arith.constant 0 : index
    %c0_24 = arith.constant 0 : index
    %49 = vector.load %arg5[%c0_23, %c0_24] : memref<1x128xf32, #tpu.memory_space<vmem>>, vector<1x128xf32>
    %50 = vector.broadcast %49 : vector<1x128xf32> to vector<16x128xf32>
    %51 = arith.addf %48, %50 : vector<16x128xf32>
    %c0_25 = arith.constant 0 : index
    %c0_26 = arith.constant 0 : index
    %52 = vector.load %arg6[%c0_25, %c0_26] : memref<16x128xf32, #tpu.memory_space<vmem>>, vector<16x128xf32>
    tpu.vector_store %arg6[%c0_25, %c0_26], %51 {strides = array<i32>} : memref<16x128xf32, #tpu.memory_space<vmem>>, vector<16x128xf32>,
    return
  }
  func.func @transform_0(%arg0: i32) -> (i32, i32) {
    %c0_i32 = arith.constant 0 : i32
    %c0_i32_0 = arith.constant 0 : i32
    return %arg0, %c0_i32 : i32, i32
  }
  func.func @transform_1(%arg0: i32) -> (i32, i32) {
    %c0_i32 = arith.constant 0 : i32
    %c0_i32_0 = arith.constant 0 : i32
    %c0_i32_1 = arith.constant 0 : i32
    return %c0_i32, %c0_i32_0 : i32, i32
  }
  func.func @transform_2(%arg0: i32) -> (i32, i32) {
    %c0_i32 = arith.constant 0 : i32
    %c0_i32_0 = arith.constant 0 : i32
    %c0_i32_1 = arith.constant 0 : i32
    return %c0_i32, %c0_i32_0 : i32, i32
  }
  func.func @transform_3(%arg0: i32) -> (i32, i32) {
    %c0_i32 = arith.constant 0 : i32
    %c0_i32_0 = arith.constant 0 : i32
    %c0_i32_1 = arith.constant 0 : i32
    return %c0_i32, %c0_i32_0 : i32, i32
  }
  func.func @transform_4(%arg0: i32) -> (i32, i32) {
    %c0_i32 = arith.constant 0 : i32
    %c0_i32_0 = arith.constant 0 : i32
    %c0_i32_1 = arith.constant 0 : i32
    return %c0_i32, %c0_i32_0 : i32, i32
  }
  func.func @transform_5(%arg0: i32) -> (i32, i32) {
    %c0_i32 = arith.constant 0 : i32
    %c0_i32_0 = arith.constant 0 : i32
    return %arg0, %c0_i32 : i32, i32
  }
}

</mosaic_0001>

<bundles_post_ra>
// kernel: tpu_custom_call.1
= control target key start
LH: loop header
LB: loop body
LE: loop exit
PB: predicated region body
PF: predicated region fallthrough
CT: control target
= control target key end

     0   :  { %10 = vsyncpa [#allocation3], 0  ;;  %s873_s0 = inlined_call_operand.hbm [shape: bf16[16,128], index: 0, kind: input, shape index: {}]   ;;  %s874_s1 = inlined_call_operand.hbm [shape: bf16[128,256], index: 1, kind: input, shape index: {}]   ;;  %s875_s2 = inlined_call_operand.vmem [shape: f32[1,256], index: 2, kind: input, shape index: {}]   ;;  %s876_s3 = inlined_call_operand.hbm [shape: bf16[256,128], index: 3, kind: input, shape index: {}]   ;;  %s877_s4 = inlined_call_operand.vmem [shape: f32[1,128], index: 4, kind: input, shape index: {}]   ;;  %s878_s5 = inlined_call_operand.hbm [shape: f32[16,128], index: 5, kind: output, shape index: {}]  }
   0x1   :  { %11 = vsyncpa [#allocation6], 0 }
   0x2   :  { %12 = vsyncpa [#allocation4], 0  ;;  %s741_s18 = smov [#allocation5]   ;;  %s647_s22 = scalar_lea.hbm %s874_s1, 2048 }
   0x3   :  { %s30_s19 = sshll.u32 %s741_s18, 4  ;;  %p648_p0 = scmp.ne.s32.totalorder %s874_s1, %s647_s22  ;;  %s31_s19 = int_to_ptr.vmem [resolvable:$true] %s30_s19 }
   0x4   :  { %p651_p1 = scmp.lt.u32.totalorder %s647_s22, %s874_s1 }
   0x6   :  { %p653_p2 = pnand %p651_p1, %p648_p0 }
   0x8   :  { %656 = shalt.err (!%p653_p2)
}
   0x9   :  { %s657_s27 = scalar_lea.vmem %s31_s19, 2048  ;;  %p662_p4 = scmp.lt.s32.totalorder %s31_s19, %s31_s19 }
   0xa   :  { %p658_p3 = scmp.ne.s32.totalorder %s31_s19, %s657_s27  ;;  %p663_p5 = scmp.lt.s32.totalorder %s657_s27, %s657_s27 }
   0xc   :  { %p664_p6 = por %p663_p5, %p662_p4 }
   0xe   :  { %p665_p7 = pnand %p664_p6, %p658_p3 }
  0x10   :  { %668 = shalt.err (!%p665_p7)
}
  0x11   :  { %s742_s28 = smov 128   ;;  %s743_s29 = smov 8  }
  0x12   :  { %36 = dma.hbm_to_vmem [thread:$0]  %s874_s1, 2048, %s31_s19, [#allocation6], %s742_s28, %s742_s28, %s743_s29  }
  0x13   :  { %s744_s7 = smov [#allocation2]   ;;  %s669_s11 = scalar_lea.hbm %s873_s0, 128 }
  0x14   :  { %s18_s8 = sshll.u32 %s744_s7, 4  ;;  %p670_p8 = scmp.ne.s32.totalorder %s873_s0, %s669_s11  ;;  %s19_s8 = int_to_ptr.vmem [resolvable:$true] %s18_s8 }
  0x15   :  { %p673_p9 = scmp.lt.u32.totalorder %s669_s11, %s873_s0 }
  0x17   :  { %p675_p10 = pnand %p673_p9, %p670_p8 }
  0x19   :  { %678 = shalt.err (!%p675_p10)
}
  0x1a   :  { %s679_s16 = scalar_lea.vmem %s19_s8, 128  ;;  %p684_p12 = scmp.lt.s32.totalorder %s19_s8, %s19_s8 }
  0x1b   :  { %p680_p11 = scmp.ne.s32.totalorder %s19_s8, %s679_s16  ;;  %p685_p13 = scmp.lt.s32.totalorder %s679_s16, %s679_s16 }
  0x1d   :  { %p686_p0 = por %p685_p13, %p684_p12 }
  0x1f   :  { %p687_p1 = pnand %p686_p0, %p680_p11 }
  0x21   :  { %690 = shalt.err (!%p687_p1)
}
  0x22   :  { %s745_s1 = smov 64   ;;  %s746_s17 = smov 4  }
  0x23   :  { %24 = dma.hbm_to_vmem [thread:$0]  %s873_s0, 128, %s19_s8, [#allocation3], %s745_s1, %s745_s1, %s746_s17  }
  0x24   :  { %s747_s20 = smov [#allocation7]   ;;  %s691_s24 = scalar_lea.hbm %s876_s3, 2048 }
  0x25   :  { %s44_s21 = sshll.u32 %s747_s20, 4  ;;  %p692_p2 = scmp.ne.s32.totalorder %s876_s3, %s691_s24  ;;  %s45_s21 = int_to_ptr.vmem [resolvable:$true] %s44_s21 }
  0x26   :  { %p695_p3 = scmp.lt.u32.totalorder %s691_s24, %s876_s3 }
  0x28   :  { %p697_p4 = pnand %p695_p3, %p692_p2 }
  0x2a   :  { %700 = shalt.err (!%p697_p4)
}
  0x2b   :  { %s701_s6 = scalar_lea.vmem %s45_s21, 2048  ;;  %p706_p6 = scmp.lt.s32.totalorder %s45_s21, %s45_s21 }
  0x2c   :  { %p702_p5 = scmp.ne.s32.totalorder %s45_s21, %s701_s6  ;;  %p707_p7 = scmp.lt.s32.totalorder %s701_s6, %s701_s6 }
  0x2e   :  { %p708_p8 = por %p707_p7, %p706_p6 }
  0x30   :  { %p709_p9 = pnand %p708_p8, %p702_p5 }
  0x32   :  { %712 = shalt.err (!%p709_p9)
}
  0x33   :  { %50 = dma.hbm_to_vmem [thread:$0]  %s876_s3, 2048, %s45_s21, [#allocation6], %s745_s1, %s745_s1, %s746_s17  }
  0x34   :  { %735 = dma.done.wait [#allocation3], 128  }
  0x35   :  { %736 = vsyncadd [#allocation3], 4294967168 }
  0x36   :  { %737 = dma.done.wait [#allocation6], 4096  }
  0x37   :  { %738 = vsyncadd [#allocation6], 4294963200  ;;  %v748_v0 = vmov 0   ;;  %v590_v1 = vld [vmem:[#allocation5 + $0x4] ss:$8 sps:$4 sm:$0xff]   ;;  %v614_v17 = vld [vmem:[#allocation2] sm:$0xff]   ;;  %v83_v34 = vlaneseq }
  0x38   :  { %211 = vmatprep.mubr.bf16.mxu0 %v748_v0  ;;  %v592_v2 = vld [vmem:[#allocation5] ss:$8 sps:$4 sm:$0xff]   ;;  %179 = vmatprep.subr.bf16.mxu0 %v590_v1  ;;  %v593_v3 = vld [vmem:[#allocation5 + $0x14] ss:$8 sps:$4 sm:$0xff]   ;;  %v595_v4 = vld [vmem:[#allocation5 + $0x10] ss:$8 sps:$4 sm:$0xff]  }
  0x39   :  { %180 = vmatpush1.bf16.msra.mxu0 %v592_v2  ;;  %v596_v5 = vld [vmem:[#allocation5 + $0x24] ss:$8 sps:$4 sm:$0xff]   ;;  %v598_v6 = vld [vmem:[#allocation5 + $0x20] ss:$8 sps:$4 sm:$0xff]   ;;  %v599_v7 = vld [vmem:[#allocation5 + $0x34] ss:$8 sps:$4 sm:$0xff]  }
  0x3a   :  { %181 = vmatprep.subr.bf16.mxu0 %v593_v3  ;;  %v601_v8 = vld [vmem:[#allocation5 + $0x30] ss:$8 sps:$4 sm:$0xff]   ;;  %v602_v9 = vld [vmem:[#allocation5 + $0x44] ss:$8 sps:$4 sm:$0xff]   ;;  %v604_v10 = vld [vmem:[#allocation5 + $0x40] ss:$8 sps:$4 sm:$0xff]  }
  0x3b   :  { %v605_v11 = vld [vmem:[#allocation5 + $0x54] ss:$8 sps:$4 sm:$0xff]   ;;  %v607_v12 = vld [vmem:[#allocation5 + $0x50] ss:$8 sps:$4 sm:$0xff]   ;;  %v608_v13 = vld [vmem:[#allocation5 + $0x64] ss:$8 sps:$4 sm:$0xff]  }
  0x3c   :  { %v610_v14 = vld [vmem:[#allocation5 + $0x60] ss:$8 sps:$4 sm:$0xff]   ;;  %v611_v15 = vld [vmem:[#allocation5 + $0x74] ss:$8 sps:$4 sm:$0xff]   ;;  %v613_v16 = vld [vmem:[#allocation5 + $0x70] ss:$8 sps:$4 sm:$0xff]  }
  0x3d   :  { %182 = vmatpush1.bf16.msra.mxu0 %v595_v4  ;;  %v615_v18 = vld [vmem:[#allocation7 + $0x40] sm:$0xff]   ;;  %v617_v20 = vld [vmem:[#allocation7 + $0x48] sm:$0xff]   ;;  %v619_v22 = vld [vmem:[#allocation7 + $0x50] sm:$0xff]   ;;  %v84_v35 = vshrl.u32 %v83_v34, 7  ;;  %s750_s10 = smov [#allocation8]  }
  0x3e   :  { %183 = vmatprep.subr.bf16.mxu0 %v596_v5  ;;  %v616_v19 = vld [vmem:[#allocation7] sm:$0xff]   ;;  %558 = vmatprep.subr.bf16.mxu1 %v615_v18  ;;  %v618_v21 = vld [vmem:[#allocation7 + $0x8] sm:$0xff]   ;;  %v620_v23 = vld [vmem:[#allocation7 + $0x10] sm:$0xff]   ;;  %s511_s11 = sshll.u32 %s750_s10, 4  ;;  %s512_s11 = int_to_ptr.vmem [resolvable:$true] %s511_s11 }
  0x3f   :  { %559 = vmatpush3.bf16.msra.mxu1 %v616_v19  ;;  %v621_v24 = vld [vmem:[#allocation7 + $0x58] sm:$0xff]   ;;  %v623_v26 = vld [vmem:[#allocation7 + $0x60] sm:$0xff]   ;;  %v625_v28 = vld [vmem:[#allocation7 + $0x68] sm:$0xff]   ;;  %v85_v36 = vsub.s32 0, %v84_v35  ;;  %v89_v38 = vsub.s32 1, %v84_v35  ;;  %s713_s12 = scalar_lea.vmem %s512_s11, 256  ;;  %p718_p11 = scmp.lt.s32.totalorder %s512_s11, %s512_s11 }
  0x40   :  { %560 = vmatprep.subr.bf16.mxu1 %v617_v20  ;;  %v622_v25 = vld [vmem:[#allocation7 + $0x18] sm:$0xff]   ;;  %v624_v27 = vld [vmem:[#allocation7 + $0x20] sm:$0xff]   ;;  %v626_v29 = vld [vmem:[#allocation7 + $0x28] sm:$0xff]   ;;  %p714_p10 = scmp.ne.s32.totalorder %s512_s11, %s713_s12  ;;  %p719_p12 = scmp.lt.s32.totalorder %s713_s12, %s713_s12 }
  0x41   :  { %184 = vmatpush1.bf16.msra.mxu0 %v598_v6  ;;  %v627_v30 = vld [vmem:[#allocation7 + $0x70] sm:$0xff]   ;;  %v629_v32 = vld [vmem:[#allocation7 + $0x78] sm:$0xff]  }
  0x42   :  { %185 = vmatprep.subr.bf16.mxu0 %v599_v7  ;;  %v628_v31 = vld [vmem:[#allocation7 + $0x30] sm:$0xff]   ;;  %v630_v33 = vld [vmem:[#allocation7 + $0x38] sm:$0xff]   ;;  %p720_p13 = por %p719_p12, %p718_p11 }
  0x43   :  { %561 = vmatpush3.bf16.msra.mxu1 %v618_v21  ;;  %v81_v37 = vld [vmem:[%s875_s2] sm:$0x3] }
  0x44   :  { %562 = vmatprep.subr.bf16.mxu1 %v619_v22  ;;  %v86_v39 = vrot.slane %v81_v37, %v85_v36  ;;  %v90_v40 = vrot.slane %v81_v37, %v89_v38  ;;  %p721_p0 = pnand %p720_p13, %p714_p10 }
  0x45   :  { %186 = vmatpush1.bf16.msra.mxu0 %v601_v8 }
  0x46   :  { %187 = vmatprep.subr.bf16.mxu0 %v602_v9 }
  0x47   :  { %563 = vmatpush3.bf16.msra.mxu1 %v620_v23 }
  0x48   :  { %564 = vmatprep.subr.bf16.mxu1 %v621_v24 }
  0x49   :  { %188 = vmatpush1.bf16.msra.mxu0 %v604_v10 }
  0x4a   :  { %189 = vmatprep.subr.bf16.mxu0 %v605_v11 }
  0x4b   :  { %565 = vmatpush3.bf16.msra.mxu1 %v622_v25 }
  0x4c   :  { %566 = vmatprep.subr.bf16.mxu1 %v623_v26 }
  0x4d   :  { %190 = vmatpush1.bf16.msra.mxu0 %v607_v12 }
  0x4e   :  { %191 = vmatprep.subr.bf16.mxu0 %v608_v13 }
  0x4f   :  { %567 = vmatpush3.bf16.msra.mxu1 %v624_v27 }
  0x50   :  { %568 = vmatprep.subr.bf16.mxu1 %v625_v28 }
  0x51   :  { %192 = vmatpush1.bf16.msra.mxu0 %v610_v14 }
  0x52   :  { %193 = vmatprep.subr.bf16.mxu0 %v611_v15 }
  0x53   :  { %569 = vmatpush3.bf16.msra.mxu1 %v626_v29 }
  0x54   :  { %570 = vmatprep.subr.bf16.mxu1 %v627_v30 }
  0x55   :  { %194 = vmatpush1.bf16.msra.mxu0 %v613_v16 }
  0x57   :  { %571 = vmatpush3.bf16.msra.mxu1 %v628_v31 }
  0x58   :  { %212 = vmatmul.mubr.bf16.vlgmr.msra.gmra.mrb[0].mxu0 %v614_v17  ;;  %572 = vmatprep.subr.bf16.mxu1 %v629_v32 }
  0x5b   :  { %573 = vmatpush3.bf16.msra.mxu1 %v630_v33 }
 0x12b   :  { %v213_v41 = vpop.f32.mrb[0].mxu0 }
 0x12c   :  { %v823_v42 = vadd.f32 %v213_v41, %v86_v39  ;;  %v215_v43 = vpop.f32.mrb[1].mxu0 }
 0x12d   :  { %v825_v44 = vadd.f32 %v215_v43, %v90_v40  ;;  %v217_v45 = vpop.f32.mrb[2].mxu0 }
 0x12e   :  { %v828_v46 = vmul.f32 0.70710677, %v823_v42  ;;  %v830_v47 = vadd.f32 %v217_v45, %v86_v39  ;;  %v219_v48 = vpop.f32.mrb[3].mxu0 }
 0x12f   :  { %v833_v49 = vmul.f32 0.70710677, %v825_v44  ;;  %v835_v50 = vadd.f32 %v219_v48, %v90_v40 }
 0x130   :  { %v238_v51 = vand.u32 2147483647, %v828_v46  ;;  %v839_v52 = vmul.f32 0.70710677, %v830_v47  ;;  %vm230_vm0 = vcmp.ge.f32.partialorder %v828_v46, 0.0 }
 0x131   :  { %v239_v53 = vand.u32 2147483647, %v833_v49  ;;  %v844_v57 = vmul.f32 0.70710677, %v835_v50  ;;  %vm231_vm1 = vcmp.ge.f32.partialorder %v833_v49, 0.0 }
 0x132   :  { %v242_v54 = vmul.f32 0.3275911, %v238_v51  ;;  %v240_v55 = vand.u32 2147483647, %v839_v52  ;;  %v290_v1 = vsub.f32 0.0, %v238_v51  ;;  %vm232_vm2 = vcmp.ge.f32.partialorder %v839_v52, 0.0 }
 0x133   :  { %v243_v56 = vmul.f32 0.3275911, %v239_v53  ;;  %v241_v61 = vand.u32 2147483647, %v844_v57  ;;  %v291_v2 = vsub.f32 0.0, %v239_v53  ;;  %vm233_vm3 = vcmp.ge.f32.partialorder %v844_v57, 0.0 }
 0x134   :  { %v246_v58 = vadd.f32 1.0, %v242_v54  ;;  %v244_v59 = vmul.f32 0.3275911, %v240_v55  ;;  %v294_v4 = vmul.f32 %v290_v1, %v238_v51  ;;  %v292_v5 = vsub.f32 0.0, %v240_v55 }
 0x135   :  { %v247_v60 = vadd.f32 1.0, %v243_v56  ;;  %v245_v63 = vmul.f32 0.3275911, %v241_v61  ;;  %v295_v8 = vmul.f32 %v291_v2, %v239_v53  ;;  %v293_v9 = vsub.f32 0.0, %v241_v61 }
 0x136   :  { %631 = vrcp.f32 %v246_v58  ;;  %v248_v62 = vadd.f32 1.0, %v244_v59  ;;  %v298_v13 = vmul.f32 1.442695, %v294_v4  ;;  %v296_v14 = vmul.f32 %v292_v5, %v240_v55 }
 0x137   :  { %633 = vrcp.f32 %v247_v60  ;;  %v249_v0 = vadd.f32 1.0, %v245_v63  ;;  %v300_v17 = vmul.f32 1.442695, %v295_v8  ;;  %v297_v20 = vmul.f32 %v293_v9, %v241_v61 }
 0x138   :  { %635 = vrcp.f32 %v248_v62  ;;  %v302_v25 = vmul.f32 1.442695, %v296_v14  ;;  %v749_v2 = vmov -1.0   ;;  %v225_v57 = vmul.f32 0.5, %v835_v50 }
 0x139   :  { %637 = vrcp.f32 %v249_v0  ;;  %v304_v30 = vmul.f32 1.442695, %v297_v20  ;;  %v234_v4 = vsel %vm230_vm0, 1.0, %v749_v2  ;;  %v235_v46 = vsel %vm231_vm1, 1.0, %v749_v2 }
 0x13a   :  { %639 = vpow2.f32 %v298_v13  ;;  %v236_v13 = vsel %vm232_vm2, 1.0, %v749_v2 }
 0x13b   :  { %641 = vpow2.f32 %v300_v17  ;;  %v224_v17 = vmul.f32 0.5, %v830_v47  ;;  %v541_v47 = vld [vmem:[%s877_s4] ss:$0 sm:$0xff] }
 0x13c   :  { %643 = vpow2.f32 %v302_v25 }
 0x13d   :  { %645 = vpow2.f32 %v304_v30 }
 0x140   :  { %v632_v3 = vpop.eup %631 }
 0x141   :  { %v634_v6 = vpop.eup %633  ;;  %v254_v7 = vmul.f32 1.0614054, %v632_v3 }
 0x142   :  { %v255_v10 = vmul.f32 1.0614054, %v634_v6  ;;  %v636_v12 = vpop.eup %635 }
 0x143   :  { %v258_v11 = vadd.f32 -1.4531521, %v254_v7  ;;  %v256_v18 = vmul.f32 1.0614054, %v636_v12  ;;  %v638_v19 = vpop.eup %637 }
 0x144   :  { %v259_v15 = vadd.f32 -1.4531521, %v255_v10  ;;  %v257_v24 = vmul.f32 1.0614054, %v638_v19  ;;  %v640_v54 = vpop.eup %639 }
 0x145   :  { %v262_v16 = vmul.f32 %v632_v3, %v258_v11  ;;  %v260_v23 = vadd.f32 -1.4531521, %v256_v18  ;;  %v642_v56 = vpop.eup %641 }
 0x146   :  { %v263_v21 = vmul.f32 %v634_v6, %v259_v15  ;;  %v261_v29 = vadd.f32 -1.4531521, %v257_v24  ;;  %v644_v1 = vpop.eup %643  ;;  %v222_v15 = vmul.f32 0.5, %v823_v42 }
 0x147   :  { %v266_v22 = vadd.f32 1.4214138, %v262_v16  ;;  %v264_v28 = vmul.f32 %v636_v12, %v260_v23  ;;  %v646_v8 = vpop.eup %645  ;;  %v237_v16 = vsel %vm233_vm3, 1.0, %v749_v2 }
 0x148   :  { %v267_v26 = vadd.f32 1.4214138, %v263_v21  ;;  %v265_v34 = vmul.f32 %v638_v19, %v261_v29 }
 0x149   :  { %v270_v27 = vmul.f32 %v632_v3, %v266_v22  ;;  %v268_v33 = vadd.f32 1.4214138, %v264_v28 }
 0x14a   :  { %v271_v31 = vmul.f32 %v634_v6, %v267_v26  ;;  %v269_v38 = vadd.f32 1.4214138, %v265_v34 }
 0x14b   :  { %v274_v32 = vadd.f32 -0.28449672, %v270_v27  ;;  %v272_v37 = vmul.f32 %v636_v12, %v268_v33 }
 0x14c   :  { %v275_v35 = vadd.f32 -0.28449672, %v271_v31  ;;  %v273_v43 = vmul.f32 %v638_v19, %v269_v38 }
 0x14d   :  { %v278_v36 = vmul.f32 %v632_v3, %v274_v32  ;;  %v276_v41 = vadd.f32 -0.28449672, %v272_v37 }
 0x14e   :  { %v279_v39 = vmul.f32 %v634_v6, %v275_v35  ;;  %v277_v53 = vadd.f32 -0.28449672, %v273_v43 }
 0x14f   :  { %v282_v40 = vadd.f32 0.2548296, %v278_v36  ;;  %v280_v51 = vmul.f32 %v636_v12, %v276_v41 }
 0x150   :  { %v283_v45 = vadd.f32 0.2548296, %v279_v39  ;;  %v281_v60 = vmul.f32 %v638_v19, %v277_v53 }
 0x151   :  { %v286_v48 = vmul.f32 %v632_v3, %v282_v40  ;;  %v284_v59 = vadd.f32 0.2548296, %v280_v51 }
 0x152   :  { %v287_v55 = vmul.f32 %v634_v6, %v283_v45  ;;  %v285_v0 = vadd.f32 0.2548296, %v281_v60 }
 0x153   :  { %v306_v58 = vmul.f32 %v640_v54, %v286_v48  ;;  %v288_v63 = vmul.f32 %v636_v12, %v284_v59 }
 0x154   :  { %v307_v61 = vmul.f32 %v642_v56, %v287_v55  ;;  %v289_v7 = vmul.f32 %v638_v19, %v285_v0  ;;  %v223_v19 = vmul.f32 0.5, %v825_v44 }
 0x155   :  { %v310_v62 = vsub.f32 1.0, %v306_v58  ;;  %v308_v6 = vmul.f32 %v644_v1, %v288_v63 }
 0x156   :  { %v311_v3 = vsub.f32 1.0, %v307_v61  ;;  %v309_v10 = vmul.f32 %v646_v8, %v289_v7 }
 0x157   :  { %v314_v5 = vmul.f32 %v310_v62, %v234_v4  ;;  %v312_v9 = vsub.f32 1.0, %v308_v6 }
 0x158   :  { %v315_v11 = vmul.f32 %v311_v3, %v235_v46  ;;  %v313_v14 = vsub.f32 1.0, %v309_v10 }
 0x159   :  { %v318_v49 = vadd.f32 1.0, %v314_v5  ;;  %v316_v12 = vmul.f32 %v312_v9, %v236_v13 }
 0x15a   :  { %v317_v52 = vmul.f32 %v313_v14, %v237_v16  ;;  %v319_v20 = vadd.f32 1.0, %v315_v11 }
 0x15b   :  { %v320_v18 = vadd.f32 1.0, %v316_v12  ;;  %v322_v21 = vmul.f32 %v318_v49, %v222_v15 }
 0x15c   :  { %v321_v23 = vadd.f32 1.0, %v317_v52  ;;  %v323_v24 = vmul.f32 %v319_v20, %v223_v19 }
 0x15d   :  { %v324_v22 = vmul.f32 %v320_v18, %v224_v17 }
 0x15e   :  { %v325_v25 = vmul.f32 %v321_v23, %v225_v57 }
 0x15f   :  { %v326_v26 = vpack.c.bf16 %v324_v22, %v322_v21 }
 0x160   :  { %v327_v27 = vpack.c.bf16 %v325_v25, %v323_v24 }
 0x162   :  { %495 = vmatprep.mubr.bf16.mxu1 %v327_v27 }
 0x163   :  { %496 = vmatmul.mubr.bf16.vlgmr.msra.gmra.mrb[0].mxu1 %v326_v26 }
 0x236   :  { %v574_v42 = vpop.f32.mrb[0].mxu1 }
 0x237   :  { %v575_v28 = vpop.f32.mrb[1].mxu1 }
 0x238   :  { %v576_v29 = vadd.f32 %v575_v28, %v574_v42  ;;  %v577_v30 = vpop.f32.mrb[2].mxu1 }
 0x239   :  { %v578_v44 = vpop.f32.mrb[3].mxu1 }
 0x23a   :  { %v498_v31 = vadd.f32 %v576_v29, %v541_v47  ;;  %v579_v50 = vadd.f32 %v578_v44, %v577_v30 }
 0x23c   :  { %504 = vst [vmem:[#allocation8] sm:$0xff] %v498_v31  ;;  %v501_v32 = vadd.f32 %v579_v50, %v541_v47 }
 0x23e   :  { %505 = vst [vmem:[#allocation8 + $0x8] sm:$0xff] %v501_v32 }
 0x23f   :  { %724 = shalt.err (!%p721_p0)
}
 0x240   :  { %s725_s14 = scalar_lea.hbm %s878_s5, 256 }
 0x241   :  { %p726_p1 = scmp.ne.s32.totalorder %s878_s5, %s725_s14  ;;  %p729_p2 = scmp.lt.u32.totalorder %s725_s14, %s878_s5 }
 0x243   :  { %p731_p3 = pnand %p729_p2, %p726_p1 }
 0x245   :  { %734 = shalt.err (!%p731_p3)
}
 0x246   :  { %517 = dma.vmem_to_hbm [thread:$0]  %s512_s11, 256, %s878_s5, [#allocation4], %s742_s28, %s742_s28, %s743_s29  }
 0x247   :  { %739 = dma.done.wait [#allocation4], 256  }
 0x248   :  { %740 = vsyncadd [#allocation4], 4294967040 }
 0x249   :  { %521 = vsyncpa [#allocation3], 1 }
 0x24a   :  { %522 = vsyncpa [#allocation6], 1 }
 0x24b   :  { %523 = vsyncpa [#allocation4], 1 }

</bundles_post_ra>
